<compile_context>
chip_gen: v7x
topology: tpu7x:2x2x1
jax: 0.10.0
libtpu: 0.0.40
codegen_flags: <defaults>
</compile_context>

<pallas_src>
import jax
import jax.numpy as jnp
from jax import lax
from jax.experimental import pallas as pl
from jax.experimental.pallas import tpu as pltpu


# ---------------------------------------------------------------------------
# Generation-aware VMEM budget.
# ---------------------------------------------------------------------------
def _vmem_budget_bytes():
    cap = 64 * 2**20  # conservative default (v7x per-core VMEM)
    try:
        info = pltpu.get_tpu_info()
        cap = int(getattr(info, "vmem_capacity_bytes", cap)) or cap
    except Exception:
        pass
    # ~60% of physical VMEM, leaving headroom for Mosaic internal scratch.
    return int(min(0.6 * cap, 96 * 2**20))


def _tb_candidates(B):
    """Legal batch-tile sizes, biggest first (multiple of 8, or the full dim)."""
    cands = []
    if B <= 1024:
        cands.append(B)
    for c in (1024, 512, 256, 128, 64, 32, 16, 8):
        if c <= B and c not in cands:
            cands.append(c)
    if not cands:
        cands.append(B)
    return cands


def _div_candidates(dim):
    """128-aligned tile candidates for a feature dim (full dim preferred)."""
    cands = [dim]
    for c in (2048, 1024, 512, 256, 128):
        if c < dim and dim % c == 0:
            cands.append(c)
    return cands


def _pick_tiles(B, in_f, out_f, avail, ex, ew, eo, in_aligned, out_aligned):
    """Pick (TB, tk, tn): prefer full-W[i] residency, then the largest batch tile."""
    tk_cands = _div_candidates(in_f) if in_aligned else [in_f]
    tn_cands = _div_candidates(out_f) if out_aligned else [out_f]
    best = None
    for tk in tk_cands:
        for tn in tn_cands:
            fixed = 2 * tk * tn * ew + 2 * tn * 4          # weight + bias (dbl buffered)
            per_row = 2 * tk * ex + 2 * tn * eo + tn * 4   # x + out (dbl) + f32 acc
            tb_fit = None
            for tb in _tb_candidates(B):
                if fixed + tb * per_row <= avail:
                    tb_fit = tb
                    break
            if tb_fit is None:
                continue
            if best is None:
                best = (tb_fit, tk, tn)
            if tb_fit >= min(B, 128):
                return tb_fit, tk, tn
    if best is not None:
        return best
    return _tb_candidates(B)[-1], tk_cands[-1], tn_cands[-1]


# ---------------------------------------------------------------------------
# Path "resident": whole weight stack in VMEM, no transposes, no blockdiag.
# ---------------------------------------------------------------------------
def _make_resident_kernel(n_vec, in_f, out_f):
    def kernel(x_ref, w_ref, b_ref, o_ref):
        # x_ref: (TB, n*in_f), w_ref: (n, in_f, out_f), b_ref: (n, out_f),
        # o_ref: (TB, n*out_f).  Static per-vector slices, one MXU dot each.
        for i in range(n_vec):
            xs = x_ref[:, i * in_f:(i + 1) * in_f]
            acc = jnp.dot(xs, w_ref[i], preferred_element_type=jnp.float32)
            acc = acc + b_ref[i:i + 1, :].astype(jnp.float32)
            o_ref[:, i * out_f:(i + 1) * out_f] = acc.astype(o_ref.dtype)
    return kernel


def _batch_linear_resident(x2, w_sel, b_sel, n_vec, in_f, out_f, out_dtype, budget):
    B, K = x2.shape
    N = n_vec * out_f
    ex = jnp.dtype(x2.dtype).itemsize
    ew = jnp.dtype(w_sel.dtype).itemsize
    eo = jnp.dtype(out_dtype).itemsize
    eb = jnp.dtype(b_sel.dtype).itemsize

    fixed = 2 * n_vec * in_f * out_f * ew + 2 * n_vec * out_f * eb
    avail = int(0.85 * budget) - fixed
    per_row = K * ex + N * eo
    TB = None
    for cand in _tb_candidates(B):
        if 2 * cand * per_row <= avail:
            TB = cand
            break
    if TB is None:
        TB = _tb_candidates(B)[-1]

    return pl.pallas_call(
        _make_resident_kernel(n_vec, in_f, out_f),
        out_shape=jax.ShapeDtypeStruct((B, N), out_dtype),
        grid_spec=pltpu.PrefetchScalarGridSpec(
            num_scalar_prefetch=0,
            grid=(pl.cdiv(B, TB),),
            in_specs=[
                pl.BlockSpec((TB, K), lambda j: (j, 0)),
                pl.BlockSpec((n_vec, in_f, out_f), lambda j: (0, 0, 0)),  # resident
                pl.BlockSpec((n_vec, out_f), lambda j: (0, 0)),           # resident
            ],
            out_specs=pl.BlockSpec((TB, N), lambda j: (j, 0)),
        ),
        compiler_params=pltpu.CompilerParams(
            dimension_semantics=("parallel",),
            vmem_limit_bytes=budget,
        ),
    )(x2, w_sel, b_sel)


# ---------------------------------------------------------------------------
# Path "tiled": big weights, 128-aligned features, no activation transposes.
# ---------------------------------------------------------------------------
def _tiled_kernel_direct(idx_ref, x_ref, w_ref, b_ref, o_ref):
    # Single K block: write the output directly, no f32 scratch round-trip.
    acc = jnp.dot(x_ref[...], w_ref[0], preferred_element_type=jnp.float32)
    o_ref[...] = (acc + b_ref[...].astype(jnp.float32)).astype(o_ref.dtype)


def _tiled_kernel(idx_ref, x_ref, w_ref, b_ref, o_ref, acc_ref):
    k = pl.program_id(3)

    @pl.when(k == 0)
    def _():
        acc_ref[...] = jnp.zeros_like(acc_ref)

    acc_ref[...] += jnp.dot(x_ref[...], w_ref[0], preferred_element_type=jnp.float32)

    @pl.when(k == pl.num_programs(3) - 1)
    def _():
        o_ref[...] = (acc_ref[...] + b_ref[...].astype(jnp.float32)).astype(o_ref.dtype)


def _batch_linear_tiled(x2, weight, bias, idx, n_vec, in_f, out_f, out_dtype,
                        budget, tiles):
    B = x2.shape[0]
    ex = jnp.dtype(x2.dtype).itemsize
    ew = jnp.dtype(weight.dtype).itemsize
    eo = jnp.dtype(out_dtype).itemsize

    if tiles is not None:
        TB, tk, tn = tiles
    else:
        TB, tk, tn = _pick_tiles(B, in_f, out_f, int(0.85 * budget),
                                 ex, ew, eo, True, True)
    kt = in_f // tk
    nt = out_f // tn
    grid = (n_vec, pl.cdiv(B, TB), nt, kt)

    # NOTE: n_vec is the outer grid axis so that (when kt == nt == 1) W[i]'s block
    # index depends only on i and stays resident across every batch tile.
    in_specs = [
        pl.BlockSpec((TB, tk), lambda i, j, n, k, idx_r: (j, i * kt + k)),
        pl.BlockSpec((1, tk, tn), lambda i, j, n, k, idx_r: (idx_r[i], k, n)),
        pl.BlockSpec((1, tn), lambda i, j, n, k, idx_r: (idx_r[i], n)),
    ]
    out_spec = pl.BlockSpec((TB, tn), lambda i, j, n, k, idx_r: (j, i * nt + n))

    if kt == 1:
        kernel, scratch = _tiled_kernel_direct, []
    else:
        kernel, scratch = _tiled_kernel, [pltpu.VMEM((TB, tn), jnp.float32)]

    return pl.pallas_call(
        kernel,
        out_shape=jax.ShapeDtypeStruct((B, n_vec * out_f), out_dtype),
        grid_spec=pltpu.PrefetchScalarGridSpec(
            num_scalar_prefetch=1,
            grid=grid,
            in_specs=in_specs,
            out_specs=out_spec,
            scratch_shapes=scratch,
        ),
        compiler_params=pltpu.CompilerParams(
            dimension_semantics=("parallel", "parallel", "parallel", "arbitrary"),
            vmem_limit_bytes=budget,
        ),
    )(idx, x2, weight, bias)


# ---------------------------------------------------------------------------
# Path "tiled_t": fallback for large weights with non-128-aligned features.
# ---------------------------------------------------------------------------
def _tiled_t_kernel(idx_ref, x_ref, w_ref, b_ref, o_ref, acc_ref):
    k = pl.program_id(3)

    @pl.when(k == 0)
    def _():
        acc_ref[...] = jnp.zeros_like(acc_ref)

    acc_ref[...] += jnp.dot(x_ref[0], w_ref[0], preferred_element_type=jnp.float32)

    @pl.when(k == pl.num_programs(3) - 1)
    def _():
        o_ref[0] = (acc_ref[...] + b_ref[...].astype(jnp.float32)).astype(o_ref.dtype)


def _batch_linear_tiled_t(x_t, weight, bias, idx, in_f, out_f, out_dtype,
                          budget, tiles):
    n_vec, B, _ = x_t.shape
    ex = jnp.dtype(x_t.dtype).itemsize
    ew = jnp.dtype(weight.dtype).itemsize
    eo = jnp.dtype(out_dtype).itemsize

    if tiles is not None:
        TB, tk, tn = tiles
    else:
        TB, tk, tn = _pick_tiles(B, in_f, out_f, int(0.85 * budget), ex, ew, eo,
                                 in_f % 128 == 0, out_f % 128 == 0)
    kt = in_f // tk
    nt = out_f // tn
    grid = (n_vec, pl.cdiv(B, TB), nt, kt)

    return pl.pallas_call(
        _tiled_t_kernel,
        out_shape=jax.ShapeDtypeStruct((n_vec, B, out_f), out_dtype),
        grid_spec=pltpu.PrefetchScalarGridSpec(
            num_scalar_prefetch=1,
            grid=grid,
            in_specs=[
                pl.BlockSpec((1, TB, tk), lambda i, j, n, k, idx_r: (i, j, k)),
                pl.BlockSpec((1, tk, tn), lambda i, j, n, k, idx_r: (idx_r[i], k, n)),
                pl.BlockSpec((1, tn), lambda i, j, n, k, idx_r: (idx_r[i], n)),
            ],
            out_specs=pl.BlockSpec((1, TB, tn), lambda i, j, n, k, idx_r: (i, j, n)),
            scratch_shapes=[pltpu.VMEM((TB, tn), jnp.float32)],
        ),
        compiler_params=pltpu.CompilerParams(
            dimension_semantics=("parallel", "parallel", "parallel", "arbitrary"),
            vmem_limit_bytes=budget,
        ),
    )(idx, x_t, weight, bias)


# ---------------------------------------------------------------------------
# Public wrapper: JAX/Pallas equivalent of BatchLinear.forward.
# ---------------------------------------------------------------------------
def batch_linear(x, weight, bias=None, indices=None, *, force_path=None, _tiles=None):
    """
    x:       (*rem, n_vectors, in_features)
    weight:  (n_vectors_total, in_features, out_features)
    bias:    (n_vectors_total, out_features) or None
    indices: optional sequence of n_vectors indices into weight/bias
    """
    *rem, n_vec, in_f = x.shape
    n_total, in_f_w, out_f = weight.shape
    assert in_f == in_f_w
    out_dtype = jnp.promote_types(x.dtype, weight.dtype)

    if indices is not None and len(indices) > 0:          # mirrors `if indices:`
        idx = jnp.asarray(indices, dtype=jnp.int32).reshape(-1)
        assert idx.shape[0] == n_vec
        has_idx = True
    else:
        idx = jnp.arange(n_vec, dtype=jnp.int32)
        has_idx = False

    B = 1
    for r in rem:
        B *= r
    x_flat = x.reshape(B, n_vec, in_f)

    budget = _vmem_budget_bytes()
    ex = jnp.dtype(x.dtype).itemsize
    ew = jnp.dtype(weight.dtype).itemsize
    eo = jnp.dtype(out_dtype).itemsize
    K = n_vec * in_f
    N = n_vec * out_f

    path = force_path
    if path is None:
        resident_need = (2 * n_vec * in_f * out_f * ew + 2 * n_vec * out_f * 4
                         + 2 * 8 * (K * ex + N * eo))
        if n_vec <= 64 and resident_need <= int(0.85 * budget):
            path = "resident"
        elif in_f % 128 == 0 and out_f % 128 == 0:
            path = "tiled"
        else:
            path = "tiled_t"

    if path == "resident":
        w_sel = weight[idx] if has_idx else weight
        if bias is not None:
            b_sel = bias[idx] if has_idx else bias
        else:
            b_sel = jnp.zeros((n_vec, out_f), dtype=out_dtype)
        x2 = x_flat.reshape(B, K)                          # contiguous, free
        out2 = _batch_linear_resident(x2, w_sel, b_sel, n_vec, in_f, out_f,
                                      out_dtype, budget)
        return out2.reshape(*rem, n_vec, out_f)

    b_full = bias if bias is not None else jnp.zeros((n_total, out_f), dtype=out_dtype)

    if path == "tiled":
        assert in_f % 128 == 0 and out_f % 128 == 0
        x2 = x_flat.reshape(B, K)                          # contiguous, free
        out2 = _batch_linear_tiled(x2, weight, b_full, idx, n_vec, in_f, out_f,
                                   out_dtype, budget, _tiles)
        return out2.reshape(*rem, n_vec, out_f)

    # "tiled_t" fallback: one activation transpose each way.
    x_t = jnp.transpose(x_flat, (1, 0, 2))                 # (n_vec, B, in_f)
    out_t = _batch_linear_tiled_t(x_t, weight, b_full, idx, in_f, out_f,
                                  out_dtype, budget, _tiles)
    return jnp.transpose(out_t, (1, 0, 2)).reshape(*rem, n_vec, out_f)


# ---------------------------------------------------------------------------
# Tests.
# ---------------------------------------------------------------------------
if __name__ == "__main__":
    key = jax.random.PRNGKey(0)
    k_w, k_b, k_x, k_w3, k_b3, k_x3, k_w4, k_b4, k_x4 = jax.random.split(key, 9)
    HI = lax.Precision.HIGHEST

    # --- case 1: small features -> "resident" path, with bias ----------------
    n_vectors, in_features, out_features = 4, 32, 32
    weight = 0.02 * jax.random.normal(
        k_w, (n_vectors, in_features, out_features), dtype=jnp.float32)
    bias = 0.1 * jax.random.normal(k_b, (n_vectors, out_features), dtype=jnp.float32)
    x = jax.random.normal(k_x, (2, 8, n_vectors, in_features), dtype=jnp.float32)

    out1 = jax.block_until_ready(batch_linear(x, weight, bias))
    ref1 = (jnp.einsum("bij,ijk->bik", x.reshape(-1, n_vectors, in_features),
                       weight, precision=HI) + bias[None]).reshape(
        2, 8, n_vectors, out_features)
    assert out1.shape == ref1.shape
    assert jnp.allclose(out1, ref1, atol=1e-4, rtol=1e-4)

    # --- case 2: indices subset, bias=None -> "resident" path ----------------
    indices = [1, 3]
    x_sub = x[..., jnp.asarray(indices), :]                # (2, 8, 2, 32)
    out2 = jax.block_until_ready(batch_linear(x_sub, weight, None, indices=indices))
    ref2 = jnp.einsum("bij,ijk->bik",
                      x_sub.reshape(-1, len(indices), in_features),
                      weight[jnp.asarray(indices)], precision=HI).reshape(
        2, 8, len(indices), out_features)
    assert jnp.allclose(out2, ref2, atol=1e-4, rtol=1e-4)

    # --- case 3: "tiled" path (no transposes), 128-aligned features ----------
    nv3, in3, out3 = 2, 256, 256
    w3 = 0.02 * jax.random.normal(k_w3, (nv3, in3, out3), dtype=jnp.float32)
    b3 = 0.1 * jax.random.normal(k_b3, (nv3, out3), dtype=jnp.float32)
    x3 = jax.random.normal(k_x3, (3, 8, nv3, in3), dtype=jnp.float32)
    ref3 = (jnp.einsum("bij,ijk->bik", x3.reshape(-1, nv3, in3), w3,
                       precision=HI) + b3[None]).reshape(3, 8, nv3, out3)
    # 3a: K/N-tiled variant (exercises the k-reduction accumulator kernel).
    out3a = jax.block_until_ready(
        batch_linear(x3, w3, b3, force_path="tiled", _tiles=(8, 128, 128)))
    assert jnp.allclose(out3a, ref3, atol=2e-4, rtol=2e-4)
    # 3b: auto tiles -> full W[i] block resident, direct-write kernel.
    out3b = jax.block_until_ready(batch_linear(x3, w3, b3, force_path="tiled"))
    assert jnp.allclose(out3b, ref3, atol=2e-4, rtol=2e-4)

    # --- case 4: "tiled_t" fallback (non-128-aligned features), with indices -
    nt4, in4, out4 = 4, 96, 80
    w4 = 0.02 * jax.random.normal(k_w4, (nt4, in4, out4), dtype=jnp.float32)
    b4 = 0.1 * jax.random.normal(k_b4, (nt4, out4), dtype=jnp.float32)
    idx4 = [2, 0, 1]
    x4 = jax.random.normal(k_x4, (2, 8, len(idx4), in4), dtype=jnp.float32)
    out4_ = jax.block_until_ready(
        batch_linear(x4, w4, b4, indices=idx4, force_path="tiled_t",
                     _tiles=(8, in4, out4)))
    ia = jnp.asarray(idx4)
    ref4 = (jnp.einsum("bij,ijk->bik", x4.reshape(-1, len(idx4), in4), w4[ia],
                       precision=HI) + b4[ia][None]).reshape(2, 8, len(idx4), out4)
    assert jnp.allclose(out4_, ref4, atol=2e-4, rtol=2e-4)

    print("KERNEL_OK")
</pallas_src>

<mosaic_0001>
module attributes {stable_mosaic.version = 11 : i64} {
  func.func @kernel(%arg0: i32, %arg1: memref<16x128xf32, #tpu.memory_space<vmem>>, %arg2: memref<4x32x32xf32, #tpu.memory_space<vmem>>, %arg3: memref<4x32xf32, #tpu.memory_space<vmem>>, %arg4: memref<16x128xf32, #tpu.memory_space<vmem>>) attributes {dimension_semantics = [#tpu.dimension_semantics<parallel>], iteration_bounds = array<i64: 1>, scalar_prefetch = 0 : i64, scratch_operands = 0 : i64, tpu.core_type = #tpu.core_type<tc>, window_params = [{transform_indices = @transform_0, window_bounds = array<i64: 16, 128>}, {pipeline_mode = #tpu.pipeline_mode<synchronous>, transform_indices = @transform_1, window_bounds = array<i64: 4, 32, 32>}, {pipeline_mode = #tpu.pipeline_mode<synchronous>, transform_indices = @transform_2, window_bounds = array<i64: 4, 32>}, {transform_indices = @transform_3, window_bounds = array<i64: 16, 128>}]} {
    %c0 = arith.constant 0 : index
    %c0_0 = arith.constant 0 : index
    %0 = vector.load %arg1[%c0, %c0_0] : memref<16x128xf32, #tpu.memory_space<vmem>>, vector<16x32xf32>
    %c0_1 = arith.constant 0 : index
    %c0_2 = arith.constant 0 : index
    %c0_3 = arith.constant 0 : index
    %1 = vector.load %arg2[%c0_1, %c0_2, %c0_3] : memref<4x32x32xf32, #tpu.memory_space<vmem>>, vector<1x32x32xf32>
    %2 = vector.shape_cast %1 : vector<1x32x32xf32> to vector<32x32xf32>
    %cst = arith.constant dense<0.000000e+00> : vector<16x32xf32>
    %3 = tpu.matmul %0, %2, %cst {dimension_numbers = #tpu.dot_dimension_numbers<[1], [0], [0], [1], [0, 0, 1, 1], [], []>} : vector<16x32xf32>, vector<32x32xf32>, vector<16x32xf32> -> vector<16x32xf32>
    %c0_4 = arith.constant 0 : index
    %c0_5 = arith.constant 0 : index
    %4 = vector.load %arg3[%c0_4, %c0_5] : memref<4x32xf32, #tpu.memory_space<vmem>>, vector<1x32xf32>
    %5 = vector.broadcast %4 : vector<1x32xf32> to vector<16x32xf32>
    %6 = arith.addf %3, %5 : vector<16x32xf32>
    %c0_6 = arith.constant 0 : index
    %c0_7 = arith.constant 0 : index
    %7 = vector.load %arg4[%c0_6, %c0_7] : memref<16x128xf32, #tpu.memory_space<vmem>>, vector<16x32xf32>
    tpu.vector_store %arg4[%c0_6, %c0_7], %6 {strides = array<i32>} : memref<16x128xf32, #tpu.memory_space<vmem>>, vector<16x32xf32>,
    %c0_8 = arith.constant 0 : index
    %c32 = arith.constant 32 : index
    %8 = vector.load %arg1[%c0_8, %c32] : memref<16x128xf32, #tpu.memory_space<vmem>>, vector<16x32xf32>
    %c1 = arith.constant 1 : index
    %c0_9 = arith.constant 0 : index
    %c0_10 = arith.constant 0 : index
    %9 = vector.load %arg2[%c1, %c0_9, %c0_10] : memref<4x32x32xf32, #tpu.memory_space<vmem>>, vector<1x32x32xf32>
    %10 = vector.shape_cast %9 : vector<1x32x32xf32> to vector<32x32xf32>
    %cst_11 = arith.constant dense<0.000000e+00> : vector<16x32xf32>
    %11 = tpu.matmul %8, %10, %cst_11 {dimension_numbers = #tpu.dot_dimension_numbers<[1], [0], [0], [1], [0, 0, 1, 1], [], []>} : vector<16x32xf32>, vector<32x32xf32>, vector<16x32xf32> -> vector<16x32xf32>
    %c1_12 = arith.constant 1 : index
    %c0_13 = arith.constant 0 : index
    %12 = vector.load %arg3[%c1_12, %c0_13] : memref<4x32xf32, #tpu.memory_space<vmem>>, vector<1x32xf32>
    %13 = vector.broadcast %12 : vector<1x32xf32> to vector<16x32xf32>
    %14 = arith.addf %11, %13 : vector<16x32xf32>
    %c0_14 = arith.constant 0 : index
    %c32_15 = arith.constant 32 : index
    %15 = vector.load %arg4[%c0_14, %c32_15] : memref<16x128xf32, #tpu.memory_space<vmem>>, vector<16x32xf32>
    tpu.vector_store %arg4[%c0_14, %c32_15], %14 {strides = array<i32>} : memref<16x128xf32, #tpu.memory_space<vmem>>, vector<16x32xf32>,
    %c0_16 = arith.constant 0 : index
    %c64 = arith.constant 64 : index
    %16 = vector.load %arg1[%c0_16, %c64] : memref<16x128xf32, #tpu.memory_space<vmem>>, vector<16x32xf32>
    %c2 = arith.constant 2 : index
    %c0_17 = arith.constant 0 : index
    %c0_18 = arith.constant 0 : index
    %17 = vector.load %arg2[%c2, %c0_17, %c0_18] : memref<4x32x32xf32, #tpu.memory_space<vmem>>, vector<1x32x32xf32>
    %18 = vector.shape_cast %17 : vector<1x32x32xf32> to vector<32x32xf32>
    %cst_19 = arith.constant dense<0.000000e+00> : vector<16x32xf32>
    %19 = tpu.matmul %16, %18, %cst_19 {dimension_numbers = #tpu.dot_dimension_numbers<[1], [0], [0], [1], [0, 0, 1, 1], [], []>} : vector<16x32xf32>, vector<32x32xf32>, vector<16x32xf32> -> vector<16x32xf32>
    %c2_20 = arith.constant 2 : index
    %c0_21 = arith.constant 0 : index
    %20 = vector.load %arg3[%c2_20, %c0_21] : memref<4x32xf32, #tpu.memory_space<vmem>>, vector<1x32xf32>
    %21 = vector.broadcast %20 : vector<1x32xf32> to vector<16x32xf32>
    %22 = arith.addf %19, %21 : vector<16x32xf32>
    %c0_22 = arith.constant 0 : index
    %c64_23 = arith.constant 64 : index
    %23 = vector.load %arg4[%c0_22, %c64_23] : memref<16x128xf32, #tpu.memory_space<vmem>>, vector<16x32xf32>
    tpu.vector_store %arg4[%c0_22, %c64_23], %22 {strides = array<i32>} : memref<16x128xf32, #tpu.memory_space<vmem>>, vector<16x32xf32>,
    %c0_24 = arith.constant 0 : index
    %c96 = arith.constant 96 : index
    %24 = vector.load %arg1[%c0_24, %c96] : memref<16x128xf32, #tpu.memory_space<vmem>>, vector<16x32xf32>
    %c3 = arith.constant 3 : index
    %c0_25 = arith.constant 0 : index
    %c0_26 = arith.constant 0 : index
    %25 = vector.load %arg2[%c3, %c0_25, %c0_26] : memref<4x32x32xf32, #tpu.memory_space<vmem>>, vector<1x32x32xf32>
    %26 = vector.shape_cast %25 : vector<1x32x32xf32> to vector<32x32xf32>
    %cst_27 = arith.constant dense<0.000000e+00> : vector<16x32xf32>
    %27 = tpu.matmul %24, %26, %cst_27 {dimension_numbers = #tpu.dot_dimension_numbers<[1], [0], [0], [1], [0, 0, 1, 1], [], []>} : vector<16x32xf32>, vector<32x32xf32>, vector<16x32xf32> -> vector<16x32xf32>
    %c3_28 = arith.constant 3 : index
    %c0_29 = arith.constant 0 : index
    %28 = vector.load %arg3[%c3_28, %c0_29] : memref<4x32xf32, #tpu.memory_space<vmem>>, vector<1x32xf32>
    %29 = vector.broadcast %28 : vector<1x32xf32> to vector<16x32xf32>
    %30 = arith.addf %27, %29 : vector<16x32xf32>
    %c0_30 = arith.constant 0 : index
    %c96_31 = arith.constant 96 : index
    %31 = vector.load %arg4[%c0_30, %c96_31] : memref<16x128xf32, #tpu.memory_space<vmem>>, vector<16x32xf32>
    tpu.vector_store %arg4[%c0_30, %c96_31], %30 {strides = array<i32>} : memref<16x128xf32, #tpu.memory_space<vmem>>, vector<16x32xf32>,
    return
  }
  func.func @transform_0(%arg0: i32) -> (i32, i32) {
    %c0_i32 = arith.constant 0 : i32
    %c0_i32_0 = arith.constant 0 : i32
    return %arg0, %c0_i32 : i32, i32
  }
  func.func @transform_1(%arg0: i32) -> (i32, i32, i32) {
    %c0_i32 = arith.constant 0 : i32
    %c0_i32_0 = arith.constant 0 : i32
    %c0_i32_1 = arith.constant 0 : i32
    %c0_i32_2 = arith.constant 0 : i32
    return %c0_i32, %c0_i32_0, %c0_i32_1 : i32, i32, i32
  }
  func.func @transform_2(%arg0: i32) -> (i32, i32) {
    %c0_i32 = arith.constant 0 : i32
    %c0_i32_0 = arith.constant 0 : i32
    %c0_i32_1 = arith.constant 0 : i32
    return %c0_i32, %c0_i32_0 : i32, i32
  }
  func.func @transform_3(%arg0: i32) -> (i32, i32) {
    %c0_i32 = arith.constant 0 : i32
    %c0_i32_0 = arith.constant 0 : i32
    return %arg0, %c0_i32 : i32, i32
  }
}

</mosaic_0001>

<bundles_post_ra>
// kernel: tpu_custom_call.1
= control target key start
LH: loop header
LB: loop body
LE: loop exit
PB: predicated region body
PF: predicated region fallthrough
CT: control target
= control target key end

     0   :  { %8 = vsyncpa [#allocation3], 0  ;;  %s779_s0 = inlined_call_operand.hbm [shape: f32[16,128], index: 0, kind: input, shape index: {}]   ;;  %s780_s1 = inlined_call_operand.hbm [shape: f32[4,32,32], index: 1, kind: input, shape index: {}]   ;;  %s781_s2 = inlined_call_operand.vmem [shape: f32[4,32], index: 2, kind: input, shape index: {}]   ;;  %s782_s3 = inlined_call_operand.hbm [shape: f32[16,128], index: 3, kind: output, shape index: {}]  }
   0x1   :  { %9 = vsyncpa [#allocation6], 0 }
   0x2   :  { %10 = vsyncpa [#allocation4], 0  ;;  %s672_s12 = smov [#allocation2]   ;;  %s600_s16 = scalar_lea.hbm %s779_s0, 256 }
   0x3   :  { %s16_s13 = sshll.u32 %s672_s12, 4  ;;  %p601_p0 = scmp.ne.s32.totalorder %s779_s0, %s600_s16  ;;  %s17_s13 = int_to_ptr.vmem [resolvable:$true] %s16_s13 }
   0x4   :  { %p604_p1 = scmp.lt.u32.totalorder %s600_s16, %s779_s0 }
   0x6   :  { %p606_p2 = pnand %p604_p1, %p601_p0 }
   0x8   :  { %609 = shalt.err (!%p606_p2)
}
   0x9   :  { %s610_s21 = scalar_lea.vmem %s17_s13, 256  ;;  %p615_p4 = scmp.lt.s32.totalorder %s17_s13, %s17_s13 }
   0xa   :  { %p611_p3 = scmp.ne.s32.totalorder %s17_s13, %s610_s21  ;;  %p616_p5 = scmp.lt.s32.totalorder %s610_s21, %s610_s21 }
   0xc   :  { %p617_p6 = por %p616_p5, %p615_p4 }
   0xe   :  { %p618_p7 = pnand %p617_p6, %p611_p3 }
  0x10   :  { %621 = shalt.err (!%p618_p7)
}
  0x11   :  { %s673_s22 = smov 128   ;;  %s674_s23 = smov 8  }
  0x12   :  { %22 = dma.hbm_to_vmem [thread:$0]  %s779_s0, 256, %s17_s13, [#allocation3], %s673_s22, %s673_s22, %s674_s23  }
  0x13   :  { %s675_s26 = smov [#allocation5]   ;;  %s622_s30 = scalar_lea.hbm %s780_s1, 2048 }
  0x14   :  { %s28_s27 = sshll.u32 %s675_s26, 4  ;;  %p623_p8 = scmp.ne.s32.totalorder %s780_s1, %s622_s30  ;;  %s29_s27 = int_to_ptr.vmem [resolvable:$true] %s28_s27 }
  0x15   :  { %p626_p9 = scmp.lt.u32.totalorder %s622_s30, %s780_s1 }
  0x17   :  { %p628_p10 = pnand %p626_p9, %p623_p8 }
  0x19   :  { %631 = shalt.err (!%p628_p10)
}
  0x1a   :  { %s632_s8 = scalar_lea.vmem %s29_s27, 2048  ;;  %p637_p12 = scmp.lt.s32.totalorder %s29_s27, %s29_s27 }
  0x1b   :  { %p633_p11 = scmp.ne.s32.totalorder %s29_s27, %s632_s8  ;;  %p638_p13 = scmp.lt.s32.totalorder %s632_s8, %s632_s8 }
  0x1d   :  { %p639_p0 = por %p638_p13, %p637_p12 }
  0x1f   :  { %p640_p1 = pnand %p639_p0, %p633_p11 }
  0x21   :  { %643 = shalt.err (!%p640_p1)
}
  0x22   :  { %34 = dma.hbm_to_vmem [thread:$0]  %s780_s1, 2048, %s29_s27, [#allocation6], %s673_s22, %s673_s22, %s674_s23  }
  0x23   :  { %666 = dma.done.wait [#allocation3], 256  }
  0x24   :  { %667 = vsyncadd [#allocation3], 4294967040 }
  0x25   :  { %668 = dma.done.wait [#allocation6], 2048  }
  0x26   :  { %669 = vsyncadd [#allocation6], 4294965248  ;;  %vm54_vm0 = vcmask 261120   ;;  %v138_v0 = vld [vmem:[#allocation2] sm:$0xff]  ;;  %v139_v1 = vld [vmem:[#allocation2 + $0x8] sm:$0xff]  ;;  %s676_s10 = smov 96  }
  0x27   :  { %v45_v2 = vld [vmem:[#allocation5] sm:$0xff]  ;;  %152 = vrot.lane.b32.xlu0 %v138_v0, %s676_s10  ;;  %s677_s11 = smov 64   ;;  %v46_v3 = vld [vmem:[#allocation5 + $0x8] sm:$0xff]  ;;  %v47_v4 = vld [vmem:[#allocation5 + $0x10] sm:$0xff]  ;;  %524 = vmatprep.mubr.msk.f32.mxu0 %vm54_vm0, %v138_v0  ;;  %s678_s1 = smov 32   ;;  %vm243_vm1 = vcmask 523520  }
  0x28   :  { %260 = vrot.lane.b32.xlu1 %v138_v0, %s677_s11  ;;  %v48_v5 = vld [vmem:[#allocation5 + $0x18] sm:$0xff]  ;;  %v560_v6 = vpack.c.bf16 %v46_v3, %v45_v2  ;;  %v141_v7 = vld [vmem:[#allocation5 + $0x20] sm:$0xff]  ;;  %v142_v8 = vld [vmem:[#allocation5 + $0x28] sm:$0xff]  ;;  %vm351_vm2 = vcmask 785920   ;;  %vm459_vm3 = vcmask 1048320  }
  0x29   :  { %v143_v9 = vld [vmem:[#allocation5 + $0x30] sm:$0xff]  ;;  %v564_v10 = vpack.c.bf16 %v48_v5, %v47_v4  ;;  %v568_v11 = vpack.c.bf16 %v142_v8, %v141_v7  ;;  %v144_v12 = vld [vmem:[#allocation5 + $0x38] sm:$0xff]  ;;  %v249_v14 = vld [vmem:[#allocation5 + $0x40] sm:$0xff] }
  0x2a   :  { %561 = vmatprep.subr.bf16.mxu0 %v560_v6  ;;  %v572_v13 = vpack.c.bf16 %v144_v12, %v143_v9  ;;  %v250_v15 = vld [vmem:[#allocation5 + $0x48] sm:$0xff]  ;;  %v357_v16 = vld [vmem:[#allocation5 + $0x60] sm:$0xff]  ;;  %v251_v20 = vld [vmem:[#allocation5 + $0x50] sm:$0xff] }
  0x2b   :  { %154 = vrot.lane.b32.xlu0 %v139_v1, %s676_s10  ;;  %v358_v17 = vld [vmem:[#allocation5 + $0x68] sm:$0xff]  ;;  %563 = vmatpush3.bf16.msra.mxu0 %v560_v6  ;;  %v576_v18 = vpack.c.bf16 %v250_v15, %v249_v14  ;;  %v252_v21 = vld [vmem:[#allocation5 + $0x58] sm:$0xff]  ;;  %v359_v25 = vld [vmem:[#allocation5 + $0x70] sm:$0xff] }
  0x2c   :  { %262 = vrot.lane.b32.xlu1 %v139_v1, %s677_s11  ;;  %569 = vmatprep.subr.bf16.mxu1 %v568_v11  ;;  %v584_v19 = vpack.c.bf16 %v358_v17, %v357_v16  ;;  %v580_v22 = vpack.c.bf16 %v252_v21, %v251_v20  ;;  %v360_v26 = vld [vmem:[#allocation5 + $0x78] sm:$0xff]  ;;  %v480_v32 = vld [vmem:[%s781_s2] ss:$0 sm:$0xff]  ;;  %v483_v37 = vld [vmem:[%s781_s2 + $0x1] ss:$0 sm:$0xff] }
  0x2d   :  { %565 = vmatprep.subr.bf16.mxu0 %v564_v10  ;;  %571 = vmatpush3.bf16.msra.mxu1 %v568_v11  ;;  %v588_v27 = vpack.c.bf16 %v360_v26, %v359_v25  ;;  %v486_v40 = vld [vmem:[%s781_s2 + $0x2] ss:$0 sm:$0xff]  ;;  %v489_v47 = vld [vmem:[%s781_s2 + $0x3] ss:$0 sm:$0xff]  ;;  %s679_s2 = smov [#allocation7]  }
  0x2e   :  { %573 = vmatprep.subr.bf16.mxu1 %v572_v13  ;;  %s467_s20 = sshll.u32 %s679_s2, 4  ;;  %s468_s20 = int_to_ptr.vmem [resolvable:$true] %s467_s20 }
  0x2f   :  { %368 = vrot.lane.b32.xlu0 %v138_v0, %s678_s1  ;;  %567 = vmatpush3.bf16.msra.mxu0 %v564_v10  ;;  %s644_s21 = scalar_lea.vmem %s468_s20, 256  ;;  %p649_p3 = scmp.lt.s32.totalorder %s468_s20, %s468_s20 }
  0x30   :  { %370 = vrot.lane.b32.xlu1 %v139_v1, %s678_s1  ;;  %577 = vmatprep.subr.bf16.mxu0 %v576_v18  ;;  %p645_p2 = scmp.ne.s32.totalorder %s468_s20, %s644_s21  ;;  %p650_p4 = scmp.lt.s32.totalorder %s644_s21, %s644_s21 }
  0x31   :  { %575 = vmatpush3.bf16.msra.mxu1 %v572_v13 }
  0x32   :  { %585 = vmatprep.subr.bf16.mxu1 %v584_v19  ;;  %525 = vmatmul.mubr.msk.f32.vlgmr.msra.gmra.mrb[0].mxu0 %vm54_vm0, %v139_v1  ;;  %p651_p5 = por %p650_p4, %p649_p3 }
  0x33   :  { %579 = vmatpush3.bf16.msra.mxu0 %v576_v18 }
  0x34   :  { %581 = vmatprep.subr.bf16.mxu0 %v580_v22  ;;  %p652_p6 = pnand %p651_p5, %p645_p2 }
  0x37   :  { %583 = vmatpush3.bf16.msra.mxu0 %v580_v22 }
  0x99   :  { %v153_v23 = vpop.permute.xlu0 %152 }
  0x9a   :  { %v261_v24 = vpop.permute.xlu1 %260  ;;  %535 = vmatprep.mubr.msk.f32.mxu1 %vm54_vm0, %v153_v23 }
  0x9b   :  { %546 = vmatprep.mubr.msk.f32.mxu0 %vm54_vm0, %v261_v24 }
  0x9d   :  { %v155_v28 = vpop.permute.xlu0 %154 }
  0x9e   :  { %v263_v29 = vpop.permute.xlu1 %262  ;;  %536 = vmatmul.mubr.msk.f32.vlgmr.msra.gmra.mrb[0].mxu1 %vm54_vm0, %v155_v28 }
  0x9f   :  { %547 = vmatmul.mubr.msk.f32.vlgmr.msra.gmra.mrb[2].mxu0 %vm54_vm0, %v263_v29  ;;  %587 = vmatpush3.bf16.msra.mxu1 %v584_v19 }
  0xa0   :  { %589 = vmatprep.subr.bf16.mxu1 %v588_v27 }
  0xa1   :  { %v369_v30 = vpop.permute.xlu0 %368 }
  0xa2   :  { %557 = vmatprep.mubr.msk.f32.mxu1 %vm54_vm0, %v369_v30  ;;  %v371_v31 = vpop.permute.xlu1 %370 }
  0xa3   :  { %591 = vmatpush3.bf16.msra.mxu1 %v588_v27 }
  0xa6   :  { %558 = vmatmul.mubr.msk.f32.vlgmr.msra.gmra.mrb[2].mxu1 %vm54_vm0, %v371_v31 }
 0x105   :  { %v526_v33 = vpop.f32.mrb[0].mxu0 }
 0x106   :  { %v133_v34 = vadd.f32 %v526_v33, %v480_v32  ;;  %v127_v35 = vpop.f32.mrb[1].mxu0 }
 0x107   :  { %v128_v36 = vadd.f32 %v480_v32, %v127_v35 }
 0x108   :  { %137 = vst.msk [vmem:[#allocation7 + $0x8] sm:$0xff] %vm54_vm0, %v133_v34 }
 0x109   :  { %136 = vst.msk [vmem:[#allocation7] sm:$0xff] %vm54_vm0, %v128_v36 }
 0x171   :  { %v537_v38 = vpop.f32.mrb[0].mxu1 }
 0x172   :  { %v548_v39 = vpop.f32.mrb[2].mxu0  ;;  %v232_v41 = vadd.f32 %v537_v38, %v483_v37  ;;  %v226_v42 = vpop.f32.mrb[1].mxu1 }
 0x173   :  { %v334_v43 = vpop.f32.mrb[3].mxu0  ;;  %v227_v44 = vadd.f32 %v483_v37, %v226_v42  ;;  %v340_v45 = vadd.f32 %v548_v39, %v486_v40 }
 0x174   :  { %239 = vrot.lane.b32.xlu1 %v232_v41, %s678_s1  ;;  %v335_v46 = vadd.f32 %v486_v40, %v334_v43 }
 0x175   :  { %237 = vrot.lane.b32.xlu0 %v227_v44, %s678_s1 }
 0x178   :  { %347 = vrot.lane.b32.xlu1 %v340_v45, %s677_s11 }
 0x179   :  { %v559_v48 = vpop.f32.mrb[2].mxu1  ;;  %345 = vrot.lane.b32.xlu0 %v335_v46, %s677_s11 }
 0x17a   :  { %v448_v49 = vadd.f32 %v559_v48, %v489_v47  ;;  %v442_v50 = vpop.f32.mrb[3].mxu1 }
 0x17b   :  { %v443_v51 = vadd.f32 %v489_v47, %v442_v50 }
 0x17c   :  { %455 = vrot.lane.b32.xlu1 %v448_v49, %s676_s10 }
 0x17d   :  { %453 = vrot.lane.b32.xlu0 %v443_v51, %s676_s10 }
 0x1e6   :  { %v240_v52 = vpop.permute.xlu1 %239 }
 0x1e7   :  { %245 = vst.msk [vmem:[#allocation7 + $0x8] sm:$0xff] %vm243_vm1, %v240_v52  ;;  %v238_v53 = vpop.permute.xlu0 %237 }
 0x1e8   :  { %244 = vst.msk [vmem:[#allocation7] sm:$0xff] %vm243_vm1, %v238_v53 }
 0x1ea   :  { %v348_v54 = vpop.permute.xlu1 %347 }
 0x1eb   :  { %353 = vst.msk [vmem:[#allocation7 + $0x8] sm:$0xff] %vm351_vm2, %v348_v54  ;;  %v346_v55 = vpop.permute.xlu0 %345 }
 0x1ec   :  { %352 = vst.msk [vmem:[#allocation7] sm:$0xff] %vm351_vm2, %v346_v55 }
 0x1ee   :  { %v456_v56 = vpop.permute.xlu1 %455 }
 0x1ef   :  { %v454_v57 = vpop.permute.xlu0 %453  ;;  %461 = vst.msk [vmem:[#allocation7 + $0x8] sm:$0xff] %vm459_vm3, %v456_v56 }
 0x1f0   :  { %460 = vst.msk [vmem:[#allocation7] sm:$0xff] %vm459_vm3, %v454_v57 }
 0x1f1   :  { %655 = shalt.err (!%p652_p6)
}
 0x1f2   :  { %s656_s26 = scalar_lea.hbm %s782_s3, 256 }
 0x1f3   :  { %p657_p7 = scmp.ne.s32.totalorder %s782_s3, %s656_s26  ;;  %p660_p8 = scmp.lt.u32.totalorder %s656_s26, %s782_s3 }
 0x1f5   :  { %p662_p9 = pnand %p660_p8, %p657_p7 }
 0x1f7   :  { %665 = shalt.err (!%p662_p9)
}
 0x1f8   :  { %473 = dma.vmem_to_hbm [thread:$0]  %s468_s20, 256, %s782_s3, [#allocation4], %s673_s22, %s673_s22, %s674_s23  }
 0x1f9   :  { %670 = dma.done.wait [#allocation4], 256  }
 0x1fa   :  { %671 = vsyncadd [#allocation4], 4294967040 }
 0x1fb   :  { %477 = vsyncpa [#allocation3], 1 }
 0x1fc   :  { %478 = vsyncpa [#allocation6], 1 }
 0x1fd   :  { %479 = vsyncpa [#allocation4], 1 }

</bundles_post_ra>
